<compile_context>
chip_gen: v7x
topology: tpu7x:2x2x1
jax: 0.10.0
libtpu: 0.0.40
codegen_flags: <defaults>
</compile_context>

<pallas_src>
import functools

import jax
import jax.numpy as jnp
from jax.experimental import pallas as pl
from jax.experimental.pallas import tpu as pltpu

LANE = 128  # TPU lane width; channel dims are padded to a multiple of this.


def _round_up(n, m):
    return ((n + m - 1) // m) * m


def _pad_axis(a, axis, new_size):
    pad = [(0, 0)] * a.ndim
    pad[axis] = (0, new_size - a.shape[axis])
    return jnp.pad(a, pad)


# ----------------------------- Pallas kernel ------------------------------ #

def _temporal_block_kernel(*refs, dilation, kernel_size, halo, halo_fetch,
                           has_prev, has_downsample, compute_dtype):
    it = iter(refs)
    x_ref = next(it)                                # (Tt, Cin) current tile
    xprev_ref = next(it) if has_prev else None      # (Tt, Cin) previous tile
    w1_ref, b1_ref, w2_ref, b2_ref = next(it), next(it), next(it), next(it)
    wds_ref = next(it) if has_downsample else None
    bds_ref = next(it) if has_downsample else None
    o_ref = next(it)                                # (Tt, Cout)

    K, d = kernel_size, dilation
    Tt, Cin = x_ref.shape
    h1_ctx = (K - 1) * d                  # extra h1 rows needed by the 2nd conv
    first = pl.program_id(1) == 0         # first time tile of this batch row

    x_cur = x_ref[...]                                          # (Tt, Cin)

    if halo > 0:
        # Causal left context = tail of the previous time tile; tile 0 uses
        # zeros (== the left zero-padding of the dilated causal conv).
        prev_tail = xprev_ref[Tt - halo_fetch:, :]              # (halo_fetch, Cin)
        prev_tail = jnp.where(first, jnp.zeros_like(prev_tail), prev_tail)
        parts = [prev_tail, x_cur]
        if halo > halo_fetch:             # sequence shorter than the halo
            parts.insert(0, jnp.zeros((halo - halo_fetch, Cin), x_cur.dtype))
        x_ext = jnp.concatenate(parts, axis=0)                  # (halo+Tt, Cin)
    else:
        x_ext = x_cur

    def fused_causal_conv(h, w_ref, b_ref, t_out):
        # K dilated taps fused into ONE MXU matmul with contraction dim K*C.
        taps = [h[k * d: k * d + t_out, :] for k in range(K)]
        a = taps[0] if K == 1 else jnp.concatenate(taps, axis=-1)
        y = jnp.dot(a.astype(compute_dtype), w_ref[...].astype(compute_dtype),
                    preferred_element_type=jnp.float32)
        return y + b_ref[...]

    # out = relu(dcc1(x)); also compute h1_ctx leading rows for the 2nd conv.
    h1 = jnp.maximum(fused_causal_conv(x_ext, w1_ref, b1_ref, Tt + h1_ctx), 0.0)
    if h1_ctx > 0:
        # Rows of h1 that correspond to times < 0 must be the zero padding of
        # dcc2 (only relevant on the first time tile).
        row = jax.lax.broadcasted_iota(jnp.int32, (Tt + h1_ctx, 1), 0)
        keep = jnp.logical_or(jnp.logical_not(first), row >= h1_ctx)
        h1 = jnp.where(keep, h1, 0.0)

    # out = relu(dcc2(out))
    h2 = jnp.maximum(fused_causal_conv(h1, w2_ref, b2_ref, Tt), 0.0)
    # TODO(synk): dropout1/dropout2 are identity (eval mode).

    # residual path (1x1 conv iff the original channel counts differ)
    if has_downsample:
        res = jnp.dot(x_cur.astype(compute_dtype),
                      wds_ref[...].astype(compute_dtype),
                      preferred_element_type=jnp.float32) + bds_ref[...]
    else:
        res = x_cur.astype(jnp.float32)

    o_ref[...] = jnp.maximum(h2 + res, 0.0).astype(o_ref.dtype)


# ------------------------------ block wrapper ------------------------------ #

def temporal_block(x_btc, p, dilation, *, time_tile=512,
                   compute_dtype=jnp.float32):
    """Run one TemporalBlock via pallas_call. x_btc: (B, T, Cin_padded)."""
    B, T, Cin = x_btc.shape
    w1, b1, w2, b2 = p["w1"], p["b1"], p["w2"], p["b2"]
    wds, bds = p["wds"], p["bds"]
    K = p["kernel_size"]
    Cout = w1.shape[1]
    has_downsample = wds is not None
    if not has_downsample:
        assert Cin == Cout, "identity residual requires matching padded channels"

    halo = 2 * (K - 1) * dilation
    # Time tile: multiple of 8 (sublanes) and >= halo so a single previous
    # tile provides the whole causal context; else fall back to one tile.
    Tt = min(_round_up(max(time_tile, 8), 8), _round_up(T, 8))
    if halo > Tt:
        Tt = _round_up(T, 8)
    T_pad = _round_up(T, Tt)
    if T_pad != T:
        x_btc = jnp.pad(x_btc, ((0, 0), (0, T_pad - T), (0, 0)))
    num_tiles = T_pad // Tt
    halo_fetch = min(halo, Tt)
    has_prev = halo > 0

    def const_spec(shape):
        nd = len(shape)
        return pl.BlockSpec(shape, lambda b, t, _nd=nd: (0,) * _nd)

    in_specs = [pl.BlockSpec((None, Tt, Cin), lambda b, t: (b, t, 0))]
    inputs = [x_btc]
    if has_prev:  # previous time tile of the same array (causal halo source)
        in_specs.append(pl.BlockSpec(
            (None, Tt, Cin), lambda b, t: (b, jnp.maximum(t - 1, 0), 0)))
        inputs.append(x_btc)
    in_specs += [const_spec(w1.shape), const_spec(b1.shape),
                 const_spec(w2.shape), const_spec(b2.shape)]
    inputs += [w1, b1, w2, b2]
    if has_downsample:
        in_specs += [const_spec(wds.shape), const_spec(bds.shape)]
        inputs += [wds, bds]

    kernel = functools.partial(
        _temporal_block_kernel, dilation=dilation, kernel_size=K,
        halo=halo, halo_fetch=halo_fetch, has_prev=has_prev,
        has_downsample=has_downsample, compute_dtype=compute_dtype)

    flops = 2 * B * T_pad * (K * Cin * Cout + K * Cout * Cout)
    if has_downsample:
        flops += 2 * B * T_pad * Cin * Cout
    bytes_accessed = 4 * (B * T_pad * ((2 if has_prev else 1) * Cin + Cout)
                          + int(w1.size) + int(b1.size)
                          + int(w2.size) + int(b2.size)
                          + (int(wds.size) + int(bds.size) if has_downsample else 0))

    out = pl.pallas_call(
        kernel,
        out_shape=jax.ShapeDtypeStruct((B, T_pad, Cout), jnp.float32),
        grid=(B, num_tiles),
        in_specs=in_specs,
        out_specs=pl.BlockSpec((None, Tt, Cout), lambda b, t: (b, t, 0)),
        compiler_params=pltpu.CompilerParams(
            dimension_semantics=("parallel", "parallel"),
            vmem_limit_bytes=32 * 1024 * 1024),
        cost_estimate=pl.CostEstimate(flops=flops, transcendentals=0,
                                      bytes_accessed=bytes_accessed),
    )(*inputs)
    return out[:, :T, :]


def tcn_forward(x_ncl, kernel_params, *, time_tile=512,
                compute_dtype=jnp.float32):
    """Full TCN forward. x_ncl: (B, C, T) like PyTorch; returns (B, C_last, T).

    compute_dtype=jnp.bfloat16 runs the MXU matmuls in bf16 (2-4x throughput
    on v5e/v6e/v7x) with f32 accumulation; default f32 is bit-faithful.
    """
    B, C, T = x_ncl.shape
    x = jnp.transpose(x_ncl, (0, 2, 1))            # NCL -> NLC
    cin_p = _round_up(C, LANE)
    if cin_p != C:
        x = jnp.pad(x, ((0, 0), (0, 0), (0, cin_p - C)))
    for i, p in enumerate(kernel_params):
        x = temporal_block(x, p, dilation=2 ** i, time_tile=time_tile,
                           compute_dtype=compute_dtype)
    x = x[:, :, :kernel_params[-1]["out_channels"]]
    return jnp.transpose(x, (0, 2, 1))             # NLC -> NCL


# --------------------------- parameter building ---------------------------- #

def _weight_norm(v, g):
    """PyTorch weight_norm along dim=0: w = g * v / ||v||_(in,k)."""
    norm = jnp.sqrt(jnp.sum(v * v, axis=(1, 2), keepdims=True))
    return (g[:, None, None] / norm) * v


def init_tcn_params(key, in_channels, channels, kernel_size):
    """Raw (PyTorch-layout) parameters: effective (weight-normed) weights."""
    params = []
    cin = in_channels
    for cout in channels:
        key, *ks = jax.random.split(key, 9)
        v1 = 0.05 * jax.random.normal(ks[0], (cout, cin, kernel_size), jnp.float32)
        g1 = jax.random.uniform(ks[1], (cout,), jnp.float32, 0.5, 1.5)
        b1 = 1e-3 * jax.random.normal(ks[2], (cout,), jnp.float32)
        v2 = 0.05 * jax.random.normal(ks[3], (cout, cout, kernel_size), jnp.float32)
        g2 = jax.random.uniform(ks[4], (cout,), jnp.float32, 0.5, 1.5)
        b2 = 1e-3 * jax.random.normal(ks[5], (cout,), jnp.float32)
        layer = {"w1_pt": _weight_norm(v1, g1), "b1": b1,      # (Cout, Cin, K)
                 "w2_pt": _weight_norm(v2, g2), "b2": b2,      # (Cout, Cout, K)
                 "wds_pt": None, "bds": None}
        if cin != cout:
            layer["wds_pt"] = 0.05 * jax.random.normal(ks[6], (cout, cin, 1),
                                                       jnp.float32)
            layer["bds"] = 1e-3 * jax.random.normal(ks[7], (cout,), jnp.float32)
        params.append(layer)
        cin = cout
    return params


def prepare_kernel_params(raw_params, in_channels):
    """Pad channels to LANE multiples and fuse the K taps: (K*Cin_p, Cout_p)."""
    kparams = []
    cin = in_channels
    for p in raw_params:
        w1_pt = p["w1_pt"]                       # (Cout, Cin, K)
        cout, _, K = w1_pt.shape
        cin_p, cout_p = _round_up(cin, LANE), _round_up(cout, LANE)

        w1 = _pad_axis(_pad_axis(w1_pt, 0, cout_p), 1, cin_p)       # (Cout_p,Cin_p,K)
        w1 = jnp.transpose(w1, (2, 1, 0)).reshape(K * cin_p, cout_p)
        w2 = _pad_axis(_pad_axis(p["w2_pt"], 0, cout_p), 1, cout_p)
        w2 = jnp.transpose(w2, (2, 1, 0)).reshape(K * cout_p, cout_p)
        b1 = _pad_axis(p["b1"], 0, cout_p).reshape(1, cout_p)
        b2 = _pad_axis(p["b2"], 0, cout_p).reshape(1, cout_p)

        entry = {"w1": w1, "b1": b1, "w2": w2, "b2": b2,
                 "wds": None, "bds": None,
                 "kernel_size": K, "out_channels": cout}
        if p["wds_pt"] is not None:
            wds = _pad_axis(_pad_axis(p["wds_pt"][:, :, 0], 0, cout_p), 1, cin_p)
            entry["wds"] = jnp.transpose(wds, (1, 0))               # (Cin_p, Cout_p)
            entry["bds"] = _pad_axis(p["bds"], 0, cout_p).reshape(1, cout_p)
        kparams.append(entry)
        cin = cout
    return kparams


# ------------------------- pure-JAX reference ------------------------------ #

def _ref_causal_conv(x, w_pt, b, dilation):
    B, T, Cin = x.shape
    Cout, _, K = w_pt.shape
    w = jnp.transpose(w_pt, (2, 1, 0))            # (K, Cin, Cout)
    y = jnp.zeros((B, T, Cout), jnp.float32) + b
    for k in range(K):
        shift = (K - 1 - k) * dilation
        xs = jnp.pad(x, ((0, 0), (shift, 0), (0, 0)))[:, :T, :]
        y = y + jnp.einsum("btc,cd->btd", xs, w[k])
    return y


def tcn_reference(x_ncl, raw_params):
    x = jnp.transpose(x_ncl, (0, 2, 1))
    for i, p in enumerate(raw_params):
        d = 2 ** i
        h1 = jax.nn.relu(_ref_causal_conv(x, p["w1_pt"], p["b1"], d))
        h2 = jax.nn.relu(_ref_causal_conv(h1, p["w2_pt"], p["b2"], d))
        if p["wds_pt"] is None:
            res = x
        else:
            res = jnp.einsum("btc,cd->btd", x, p["wds_pt"][:, :, 0].T) + p["bds"]
        x = jax.nn.relu(h2 + res)
    return jnp.transpose(x, (0, 2, 1))


# --------------------------------- main ------------------------------------ #

if __name__ == "__main__":
    key = jax.random.PRNGKey(0)
    B, Cin, T = 2, 4, 64
    channels = [8, 8]
    kernel_size = 2

    kparams_key, kx = jax.random.split(key)
    raw_params = init_tcn_params(kparams_key, Cin, channels, kernel_size)
    kparams = prepare_kernel_params(raw_params, Cin)
    x_ncl = jax.random.normal(kx, (B, Cin, T), jnp.float32)   # PyTorch NCL layout

    # small time_tile so the halo/multi-tile pipeline path is exercised
    y = tcn_forward(x_ncl, kparams, time_tile=16, compute_dtype=jnp.float32)
    y = jax.block_until_ready(y)

    y_ref = tcn_reference(x_ncl, raw_params)
    assert y.shape == (B, channels[-1], T), y.shape
    assert jnp.allclose(y, y_ref, atol=1e-5, rtol=1e-5), "mismatch vs reference"

    # bf16 MXU path (f32 accumulation): higher throughput, ~1e-2 abs error.
    y_bf16 = tcn_forward(x_ncl, kparams, time_tile=16, compute_dtype=jnp.bfloat16)
    y_bf16 = jax.block_until_ready(y_bf16)
    assert y_bf16.shape == (B, channels[-1], T)
    assert bool(jnp.all(jnp.isfinite(y_bf16)))

    print("KERNEL_OK")
</pallas_src>

<mosaic_0001>
module attributes {stable_mosaic.version = 11 : i64} {
  func.func @_temporal_block_kernel(%arg0: i32, %arg1: i32, %arg2: memref<1x16x128xf32, #tpu.memory_space<vmem>>, %arg3: memref<1x16x128xf32, #tpu.memory_space<vmem>>, %arg4: memref<256x128xf32, #tpu.memory_space<vmem>>, %arg5: memref<1x128xf32, #tpu.memory_space<vmem>>, %arg6: memref<256x128xf32, #tpu.memory_space<vmem>>, %arg7: memref<1x128xf32, #tpu.memory_space<vmem>>, %arg8: memref<128x128xf32, #tpu.memory_space<vmem>>, %arg9: memref<1x128xf32, #tpu.memory_space<vmem>>, %arg10: memref<1x16x128xf32, #tpu.memory_space<vmem>>) attributes {dimension_semantics = [#tpu.dimension_semantics<parallel>, #tpu.dimension_semantics<parallel>], iteration_bounds = array<i64: 2, 4>, scalar_prefetch = 0 : i64, scratch_operands = 0 : i64, tpu.core_type = #tpu.core_type<tc>, window_params = [{transform_indices = @transform_0, window_bounds = array<i64: 1, 16, 128>}, {transform_indices = @transform_1, window_bounds = array<i64: 1, 16, 128>}, {pipeline_mode = #tpu.pipeline_mode<synchronous>, transform_indices = @transform_2, window_bounds = array<i64: 256, 128>}, {pipeline_mode = #tpu.pipeline_mode<synchronous>, transform_indices = @transform_3, window_bounds = array<i64: 1, 128>}, {pipeline_mode = #tpu.pipeline_mode<synchronous>, transform_indices = @transform_4, window_bounds = array<i64: 256, 128>}, {pipeline_mode = #tpu.pipeline_mode<synchronous>, transform_indices = @transform_5, window_bounds = array<i64: 1, 128>}, {pipeline_mode = #tpu.pipeline_mode<synchronous>, transform_indices = @transform_6, window_bounds = array<i64: 128, 128>}, {pipeline_mode = #tpu.pipeline_mode<synchronous>, transform_indices = @transform_7, window_bounds = array<i64: 1, 128>}, {transform_indices = @transform_8, window_bounds = array<i64: 1, 16, 128>}]} {
    %c0_i32 = arith.constant 0 : i32
    %0 = arith.cmpi eq, %arg1, %c0_i32 : i32
    %c0 = arith.constant 0 : index
    %c0_0 = arith.constant 0 : index
    %c0_1 = arith.constant 0 : index
    %1 = vector.load %arg2[%c0, %c0_0, %c0_1] : memref<1x16x128xf32, #tpu.memory_space<vmem>>, vector<1x16x128xf32>
    %2 = vector.shape_cast %1 : vector<1x16x128xf32> to vector<16x128xf32>
    %c0_2 = arith.constant 0 : index
    %c14 = arith.constant 14 : index
    %c0_3 = arith.constant 0 : index
    %3 = vector.load %arg3[%c0_2, %c14, %c0_3] : memref<1x16x128xf32, #tpu.memory_space<vmem>>, vector<1x2x128xf32>
    %4 = vector.shape_cast %3 : vector<1x2x128xf32> to vector<2x128xf32>
    %cst = arith.constant 0.000000e+00 : f32
    %5 = vector.broadcast %cst : f32 to vector<2x128xf32>
    %6 = arith.select %0, %5, %4 : vector<2x128xf32>
    %7 = tpu.concatenate %6, %2 in 0 : vector<2x128xf32>, vector<16x128xf32> -> vector<18x128xf32>
    %8 = vector.extract_strided_slice %7 {offsets = [0, 0], sizes = [17, 128], strides = [1, 1]} : vector<18x128xf32> to vector<17x128xf32>
    %9 = vector.extract_strided_slice %7 {offsets = [1, 0], sizes = [17, 128], strides = [1, 1]} : vector<18x128xf32> to vector<17x128xf32>
    %10 = tpu.concatenate %8, %9 in 1 : vector<17x128xf32>, vector<17x128xf32> -> vector<17x256xf32>
    %c0_4 = arith.constant 0 : index
    %c0_5 = arith.constant 0 : index
    %11 = vector.load %arg4[%c0_4, %c0_5] : memref<256x128xf32, #tpu.memory_space<vmem>>, vector<256x128xf32>
    %cst_6 = arith.constant dense<0.000000e+00> : vector<17x128xf32>
    %12 = tpu.matmul %10, %11, %cst_6 {dimension_numbers = #tpu.dot_dimension_numbers<[1], [0], [0], [1], [0, 0, 1, 1], [], []>} : vector<17x256xf32>, vector<256x128xf32>, vector<17x128xf32> -> vector<17x128xf32>
    %c0_7 = arith.constant 0 : index
    %c0_8 = arith.constant 0 : index
    %13 = vector.load %arg5[%c0_7, %c0_8] : memref<1x128xf32, #tpu.memory_space<vmem>>, vector<1x128xf32>
    %14 = vector.broadcast %13 : vector<1x128xf32> to vector<17x128xf32>
    %15 = arith.addf %12, %14 : vector<17x128xf32>
    %cst_9 = arith.constant 0.000000e+00 : f32
    %16 = vector.broadcast %cst_9 : f32 to vector<17x128xf32>
    %17 = arith.maximumf %15, %16 : vector<17x128xf32>
    %18 = tpu.iota {dimensions = array<i32: 0>} : vector<17x1xi32>
    %true = arith.constant true
    %19 = arith.xori %0, %true : i1
    %c1_i32 = arith.constant 1 : i32
    %20 = vector.broadcast %c1_i32 : i32 to vector<17x1xi32>
    %21 = arith.cmpi sge, %18, %20 : vector<17x1xi32>
    %22 = vector.broadcast %19 : i1 to vector<17x1xi1>
    %23 = arith.ori %22, %21 : vector<17x1xi1>
    %cst_10 = arith.constant 0.000000e+00 : f32
    %24 = vector.shape_cast %23 : vector<17x1xi1> to vector<17x1xi1>
    %25 = vector.broadcast %24 : vector<17x1xi1> to vector<17x128xi1>
    %26 = vector.broadcast %cst_10 : f32 to vector<17x128xf32>
    %27 = arith.select %25, %17, %26 : vector<17x128xi1>, vector<17x128xf32>
    %28 = vector.extract_strided_slice %27 {offsets = [0, 0], sizes = [16, 128], strides = [1, 1]} : vector<17x128xf32> to vector<16x128xf32>
    %29 = vector.extract_strided_slice %27 {offsets = [1, 0], sizes = [16, 128], strides = [1, 1]} : vector<17x128xf32> to vector<16x128xf32>
    %30 = tpu.concatenate %28, %29 in 1 : vector<16x128xf32>, vector<16x128xf32> -> vector<16x256xf32>
    %c0_11 = arith.constant 0 : index
    %c0_12 = arith.constant 0 : index
    %31 = vector.load %arg6[%c0_11, %c0_12] : memref<256x128xf32, #tpu.memory_space<vmem>>, vector<256x128xf32>
    %cst_13 = arith.constant dense<0.000000e+00> : vector<16x128xf32>
    %32 = tpu.matmul %30, %31, %cst_13 {dimension_numbers = #tpu.dot_dimension_numbers<[1], [0], [0], [1], [0, 0, 1, 1], [], []>} : vector<16x256xf32>, vector<256x128xf32>, vector<16x128xf32> -> vector<16x128xf32>
    %c0_14 = arith.constant 0 : index
    %c0_15 = arith.constant 0 : index
    %33 = vector.load %arg7[%c0_14, %c0_15] : memref<1x128xf32, #tpu.memory_space<vmem>>, vector<1x128xf32>
    %34 = vector.broadcast %33 : vector<1x128xf32> to vector<16x128xf32>
    %35 = arith.addf %32, %34 : vector<16x128xf32>
    %cst_16 = arith.constant 0.000000e+00 : f32
    %36 = vector.broadcast %cst_16 : f32 to vector<16x128xf32>
    %37 = arith.maximumf %35, %36 : vector<16x128xf32>
    %c0_17 = arith.constant 0 : index
    %c0_18 = arith.constant 0 : index
    %38 = vector.load %arg8[%c0_17, %c0_18] : memref<128x128xf32, #tpu.memory_space<vmem>>, vector<128x128xf32>
    %cst_19 = arith.constant dense<0.000000e+00> : vector<16x128xf32>
    %39 = tpu.matmul %2, %38, %cst_19 {dimension_numbers = #tpu.dot_dimension_numbers<[1], [0], [0], [1], [0, 0, 1, 1], [], []>} : vector<16x128xf32>, vector<128x128xf32>, vector<16x128xf32> -> vector<16x128xf32>
    %c0_20 = arith.constant 0 : index
    %c0_21 = arith.constant 0 : index
    %40 = vector.load %arg9[%c0_20, %c0_21] : memref<1x128xf32, #tpu.memory_space<vmem>>, vector<1x128xf32>
    %41 = vector.broadcast %40 : vector<1x128xf32> to vector<16x128xf32>
    %42 = arith.addf %39, %41 : vector<16x128xf32>
    %43 = arith.addf %37, %42 : vector<16x128xf32>
    %cst_22 = arith.constant 0.000000e+00 : f32
    %44 = vector.broadcast %cst_22 : f32 to vector<16x128xf32>
    %45 = arith.maximumf %43, %44 : vector<16x128xf32>
    %c0_23 = arith.constant 0 : index
    %c0_24 = arith.constant 0 : index
    %c0_25 = arith.constant 0 : index
    %46 = vector.load %arg10[%c0_23, %c0_24, %c0_25] : memref<1x16x128xf32, #tpu.memory_space<vmem>>, vector<1x16x128xf32>
    %47 = vector.shape_cast %46 : vector<1x16x128xf32> to vector<16x128xf32>
    %48 = vector.shape_cast %45 : vector<16x128xf32> to vector<1x16x128xf32>
    tpu.vector_store %arg10[%c0_23, %c0_24, %c0_25], %48 {strides = array<i32>} : memref<1x16x128xf32, #tpu.memory_space<vmem>>, vector<1x16x128xf32>,
    return
  }
  func.func @transform_0(%arg0: i32, %arg1: i32) -> (i32, i32, i32) {
    %c0_i32 = arith.constant 0 : i32
    %c0_i32_0 = arith.constant 0 : i32
    return %arg0, %arg1, %c0_i32 : i32, i32, i32
  }
  func.func @transform_1(%arg0: i32, %arg1: i32) -> (i32, i32, i32) {
    %c1_i32 = arith.constant 1 : i32
    %0 = arith.subi %arg1, %c1_i32 : i32
    %c0_i32 = arith.constant 0 : i32
    %1 = arith.maxsi %0, %c0_i32 : i32
    %c0_i32_0 = arith.constant 0 : i32
    %c0_i32_1 = arith.constant 0 : i32
    return %arg0, %1, %c0_i32_0 : i32, i32, i32
  }
  func.func @transform_2(%arg0: i32, %arg1: i32) -> (i32, i32) {
    %c0_i32 = arith.constant 0 : i32
    %c0_i32_0 = arith.constant 0 : i32
    %c0_i32_1 = arith.constant 0 : i32
    return %c0_i32, %c0_i32_0 : i32, i32
  }
  func.func @transform_3(%arg0: i32, %arg1: i32) -> (i32, i32) {
    %c0_i32 = arith.constant 0 : i32
    %c0_i32_0 = arith.constant 0 : i32
    %c0_i32_1 = arith.constant 0 : i32
    return %c0_i32, %c0_i32_0 : i32, i32
  }
  func.func @transform_4(%arg0: i32, %arg1: i32) -> (i32, i32) {
    %c0_i32 = arith.constant 0 : i32
    %c0_i32_0 = arith.constant 0 : i32
    %c0_i32_1 = arith.constant 0 : i32
    return %c0_i32, %c0_i32_0 : i32, i32
  }
  func.func @transform_5(%arg0: i32, %arg1: i32) -> (i32, i32) {
    %c0_i32 = arith.constant 0 : i32
    %c0_i32_0 = arith.constant 0 : i32
    %c0_i32_1 = arith.constant 0 : i32
    return %c0_i32, %c0_i32_0 : i32, i32
  }
  func.func @transform_6(%arg0: i32, %arg1: i32) -> (i32, i32) {
    %c0_i32 = arith.constant 0 : i32
    %c0_i32_0 = arith.constant 0 : i32
    %c0_i32_1 = arith.constant 0 : i32
    return %c0_i32, %c0_i32_0 : i32, i32
  }
  func.func @transform_7(%arg0: i32, %arg1: i32) -> (i32, i32) {
    %c0_i32 = arith.constant 0 : i32
    %c0_i32_0 = arith.constant 0 : i32
    %c0_i32_1 = arith.constant 0 : i32
    return %c0_i32, %c0_i32_0 : i32, i32
  }
  func.func @transform_8(%arg0: i32, %arg1: i32) -> (i32, i32, i32) {
    %c0_i32 = arith.constant 0 : i32
    %c0_i32_0 = arith.constant 0 : i32
    return %arg0, %arg1, %c0_i32 : i32, i32, i32
  }
}

</mosaic_0001>

<bundles_post_ra>
// kernel: tpu_custom_call.1
= control target key start
LH: loop header
LB: loop body
LE: loop exit
PB: predicated region body
PF: predicated region fallthrough
CT: control target
= control target key end

     0   :  { %s2227_s0 = inlined_call_operand.hbm [shape: f32[2,64,128], index: 0, kind: input, shape index: {}]   ;;  %s2228_s1 = inlined_call_operand.hbm [shape: f32[2,64,128], index: 1, kind: input, shape index: {}]   ;;  %s2229_s2 = inlined_call_operand.hbm [shape: f32[256,128], index: 2, kind: input, shape index: {}]   ;;  %s2230_s3 = inlined_call_operand.vmem [shape: f32[1,128], index: 3, kind: input, shape index: {}]   ;;  %s2231_s4 = inlined_call_operand.hbm [shape: f32[256,128], index: 4, kind: input, shape index: {}]   ;;  %s2232_s5 = inlined_call_operand.vmem [shape: f32[1,128], index: 5, kind: input, shape index: {}]   ;;  %s2233_s6 = inlined_call_operand.hbm [shape: f32[128,128], index: 6, kind: input, shape index: {}]   ;;  %s2234_s7 = inlined_call_operand.vmem [shape: f32[1,128], index: 7, kind: input, shape index: {}]   ;;  %s2235_s8 = inlined_call_operand.hbm [shape: f32[2,64,128], index: 8, kind: output, shape index: {}]  }
   0x1   :  { %2254 = sst [smem:[#allocation24_spill]] %s2229_s2 }
   0x2   :  { %2255 = sst [smem:[#allocation25_spill]] %s2230_s3 }
   0x3   :  { %2256 = sst [smem:[#allocation26_spill]] %s2231_s4 }
   0x4   :  { %2257 = sst [smem:[#allocation27_spill]] %s2232_s5 }
   0x5   :  { %2258 = sst [smem:[#allocation28_spill]] %s2233_s6 }
   0x6   :  { %2259 = sst [smem:[#allocation29_spill]] %s2234_s7 }
   0x7   :  { %2260 = sst [smem:[#allocation30_spill]] %s2235_s8 }
   0x8   :  { %13 = vsyncpa [#allocation3], 0 }
   0x9   :  { %15 = vsyncpa [#allocation3 + $0x1], 0 }
   0xa   :  { %16 = vsyncpa [#allocation6], 0 }
   0xb   :  { %18 = vsyncpa [#allocation6 + $0x1], 0 }
   0xc   :  { %19 = vsyncpa [#allocation9], 0 }
   0xd   :  { %20 = vsyncpa [#allocation4], 0 }
   0xe   :  { %22 = vsyncpa [#allocation4 + $0x1], 0  ;;  %s1747_s27 = smov 0   ;;  %s1749_s28 = smov 0  }
   0xf   :  { %s1751_s29 = smov 0   ;;  %s1753_s30 = smov 0  }
  0x10   :  { %s1755_s9 = smov 0   ;;  %s1757_s10 = smov 0  }
  0x11   :  { %s1759_s11 = smov 0   ;;  %s1761_s12 = smov 0  }
  0x12   :  { %s1763_s13 = smov 0   ;;  %s1765_s14 = smov 0  }
  0x13   :  { %s1767_s15 = smov 0  }
  0x14 LB: > { %2261 = sst [smem:[#allocation17_spill]] %s1662_s30  ;;  %s1801_s16 = sadd.s32 4294967295, %s1690_s15   ;;  %s1690_s15 = sphi %s1767_s15, %s28_s15   ;;  %s1686_s14 = sphi %s1765_s14, %s2318_s14   ;;  %s1682_s13 = sphi %s1763_s13, %s2317_s13   ;;  %s1678_s12 = sphi %s1761_s12, %s2316_s12   ;;  %s1674_s11 = sphi %s1759_s11, %s2315_s11   ;;  %s1670_s10 = sphi %s1757_s10, %s2314_s10   ;;  %s1666_s9 = sphi %s1755_s9, %s2313_s9   ;;  %s1662_s30 = sphi %s1753_s30, %s2312_s30   ;;  %s1658_s29 = sphi %s1751_s29, %s2311_s29   ;;  %s1654_s28 = sphi %s1749_s28, %s2310_s28   ;;  %s1650_s27 = sphi %s1747_s27, %s2309_s27  }
  0x15   : > { %2262 = sst [smem:[#allocation18_spill]] %s1674_s11  ;;  %s1008_s17 = sadd.s32 4294967294, %s1690_s15  }
  0x16   : > { %2263 = sst [smem:[#allocation19_spill]] %s1678_s12  ;;  %p62_p0 = scmp.ne.s32.totalorder %s1666_s9, %s1662_s30 }
  0x17   : > { %p2239_p1 = scmp.eq.s32.totalorder %s1801_s16, 0  ;;  %p96_p2 = scmp.ne.s32.totalorder %s1654_s28, %s1650_s27 }
  0x18   : > { %p254_p5 = scmp.eq.s32.totalorder %s1008_s17, 7  ;;  %p1011_p7 = scmp.ge.s32.totalorder %s1690_s15, 1 }
  0x19   : > { %p1811_p4 = por %p2239_p1, %p62_p0  ;;  %p1817_p6 = por %p96_p2, %p2239_p1 }
  0x1a   : > { %p1822_p8 = por %p254_p5, %p62_p0  ;;  %p261_p9 = scmp.lt.s32.totalorder %s1690_s15, 9 }
  0x1b   : > { %s2264_s18 = scalar_select %p1811_p4, 1, 0 }
  0x1c   : > { %s2265_s19 = scalar_select %p1817_p6, 1, 0 }
  0x1d   : > { %s2267_s20 = scalar_select %p1822_p8, 1, 0 }
  0x1e   : > { %2266 = sst [smem:[#allocation20_spill]] %s2265_s19  ;;  %p1827_p10 = pnand %p1011_p7, %p261_p9 }
  0x1f   : > { %2268 = sst [smem:[#allocation21_spill]] %s2267_s20  ;;  %s1692_s22 = smov [#allocation7]  }
  0x20   : > { %s2269_s21 = scalar_select %p1827_p10, 1, 0 }
  0x21   : > { %s273_s23 = sshll.u32 %s1692_s22, 4  ;;  %p1288_p11 = pneg %p1827_p10  ;;  %s1831_s23 = int_to_ptr.vmem [resolvable:$true] %s273_s23 }
  0x22   : > { %s1693_s25 = smov [#allocation8]   ;;  %s1694_s27 = smov [#allocation10]  }
  0x23   : > { %p1837_p12 = pnand %p1288_p11, %p2239_p1  ;;  %s289_s26 = sshll.u32 %s1693_s25, 4  ;;  %s1841_s26 = int_to_ptr.vmem [resolvable:$true] %s289_s26 }
  0x24   : > { %s1843_s17 = sshll.u32 %s1694_s27, 4  ;;  %s2271_s2 = sld [smem:[#allocation24_spill]]  ;;  %s306_s17 = int_to_ptr.vmem [resolvable:$true] %s1843_s17 }
  0x25   : > { %p1853_p0 = pneg %p1837_p12 }
  0x2a   : > { %s1412_s22 = scalar_lea.hbm %s2271_s2, 4096 }
  0x2b   : > { %p1413_p13 = scmp.ne.s32.totalorder %s2271_s2, %s1412_s22  ;;  %p1419_p7 = scmp.lt.u32.totalorder %s1412_s22, %s2271_s2 }
  0x2d   : > { %p1415_p2 = pnand %p1853_p0, %p1413_p13 }
  0x2f   : > { %p1416_p5 = pneg %p1415_p2 }
  0x31   : > { %p1421_p9 = pnand %p1419_p7, %p1416_p5 }
  0x33   : > { %1424 = shalt.err (!%p1421_p9)
}
  0x34   : > { %s1425_s7 = scalar_lea.vmem %s1831_s23, 4096  ;;  %p1433_p8 = scmp.lt.s32.totalorder %s1831_s23, %s1831_s23 }
  0x35   : > { %p1426_p11 = scmp.ne.s32.totalorder %s1831_s23, %s1425_s7  ;;  %p1434_p6 = scmp.lt.s32.totalorder %s1425_s7, %s1425_s7 }
  0x37   : > { %p1428_p1 = pnand %p1426_p11, %p1853_p0  ;;  %p1435_p13 = por %p1434_p6, %p1433_p8 }
  0x39   : > { %p1429_p3 = pneg %p1428_p1 }
  0x3b   : > { %p1436_p2 = pnand %p1435_p13, %p1429_p3 }
  0x3d   : > { %1439 = shalt.err (!%p1436_p2)
}
  0x3e   : > { %s2246_s8 = smov 128   ;;  %s2248_s30 = smov 8  }
  0x3f   : > { %1291 = dma.hbm_to_vmem [thread:$0]  (!%p1837_p12), %s2271_s2, 4096, %s1831_s23, [#allocation6], %s2246_s8, %s2246_s8, %s2248_s30  }
  0x40   : > { %s2273_s4 = sld [smem:[#allocation26_spill]] }
  0x46   : > { %s1440_s7 = scalar_lea.hbm %s2273_s4, 4096 }
  0x47   : > { %p1441_p1 = scmp.ne.s32.totalorder %s2273_s4, %s1440_s7  ;;  %p1447_p8 = scmp.lt.u32.totalorder %s1440_s7, %s2273_s4 }
  0x49   : > { %p1443_p3 = pnand %p1441_p1, %p1853_p0 }
  0x4b   : > { %p1444_p6 = pneg %p1443_p3 }
  0x4d   : > { %p1449_p5 = pnand %p1447_p8, %p1444_p6 }
  0x4f   : > { %1452 = shalt.err (!%p1449_p5)
}
  0x50   : > { %s1453_s23 = scalar_lea.vmem %s1841_s26, 4096  ;;  %p1461_p13 = scmp.lt.s32.totalorder %s1841_s26, %s1841_s26 }
  0x51   : > { %p1454_p7 = scmp.ne.s32.totalorder %s1841_s26, %s1453_s23  ;;  %p1462_p2 = scmp.lt.s32.totalorder %s1453_s23, %s1453_s23 }
  0x53   : > { %p1456_p9 = pnand %p1454_p7, %p1853_p0  ;;  %p1463_p1 = por %p1462_p2, %p1461_p13 }
  0x55   : > { %p1457_p11 = pneg %p1456_p9 }
  0x57   : > { %p1464_p3 = pnand %p1463_p1, %p1457_p11 }
  0x59   : > { %1467 = shalt.err (!%p1464_p3)
}
  0x5a   : > { %1294 = dma.hbm_to_vmem [thread:$0]  (!%p1837_p12), %s2273_s4, 4096, %s1841_s26, [#allocation9], %s2246_s8, %s2246_s8, %s2248_s30  }
  0x5b   : > { %s2274_s6 = sld [smem:[#allocation28_spill]] }
  0x61   : > { %s1468_s20 = scalar_lea.hbm %s2274_s6, 2048 }
  0x62   : > { %p1469_p6 = scmp.ne.s32.totalorder %s2274_s6, %s1468_s20  ;;  %p1475_p7 = scmp.lt.u32.totalorder %s1468_s20, %s2274_s6 }
  0x64   : > { %p1471_p8 = pnand %p1469_p6, %p1853_p0 }
  0x66   : > { %p1472_p5 = pneg %p1471_p8 }
  0x68   : > { %p1477_p9 = pnand %p1475_p7, %p1472_p5 }
  0x6a   : > { %1480 = shalt.err (!%p1477_p9)
}
  0x6b   : > { %s1481_s23 = scalar_lea.vmem %s306_s17, 2048  ;;  %p1489_p1 = scmp.lt.s32.totalorder %s306_s17, %s306_s17 }
  0x6c   : > { %p1482_p11 = scmp.ne.s32.totalorder %s306_s17, %s1481_s23  ;;  %p1490_p3 = scmp.lt.s32.totalorder %s1481_s23, %s1481_s23 }
  0x6e   : > { %p1484_p13 = pnand %p1482_p11, %p1853_p0  ;;  %p1491_p4 = por %p1490_p3, %p1489_p1 }
  0x70   : > { %p1485_p2 = pneg %p1484_p13 }
  0x72   : > { %p1492_p10 = pnand %p1491_p4, %p1485_p2 }
  0x74   : > { %1495 = shalt.err (!%p1492_p10)
}
  0x75   : > { %1297 = dma.hbm_to_vmem [thread:$0]  (!%p1837_p12), %s2274_s6, 2048, %s306_s17, [#allocation9], %s2246_s8, %s2246_s8, %s2248_s30  }
  0x76   : > { %s37_s5 = sadd.s32 1, %s1682_s13  ;;  %s40_s24 = sadd.s32 1, %s1686_s14 }
  0x77   : > { %p38_p4 = scmp.ge.s32.totalorder %s37_s5, 4  ;;  %s49_s11 = sadd.s32 1, %s1670_s10 }
  0x78   : > { %p56_p10 = scmp.ne.s32.totalorder %s1670_s10, %s1666_s9  ;;  %p2253_p0 = scmp.eq.s32.totalorder %s1690_s15, 0 }
  0x79   : > { %s2320_s5 = smov (%p38_p4, %s37_s5), 0  ;;  %s2322_s24 = smov (!%p38_p4, %s40_s24), %s1686_s14 }
  0x7a   : > { %2275 = sst [smem:[#allocation22_spill]] %s2320_s5  ;;  %s45_s12 = ssub.s32 %s1682_s13, %s2320_s5 }
  0x7b   : > { %p42_p6 = scmp.ge.s32.totalorder %s2322_s24, 2  ;;  %s1009_s17 = sadd.s32 4294967295, %s1682_s13 }
  0x7c   : > { %p1942_p12 = por %p2253_p0, %p56_p10  ;;  %p73_p8 = scmp.gt.s32.totalorder %s1009_s17, 0 }
  0x7d   : > { %s2324_s24 = smov (%p42_p6, %s2322_s24), 0  ;;  %s1010_s22 = sadd.s32 4294967295, %s2320_s5 }
  0x7e   : > { %2277 = sst [smem:[#allocation23_spill]] %s2324_s24  ;;  %s2326_s17 = smov (!%p73_p8, %s1009_s17), 0 }
  0x7f   : > { %s44_s20 = ssub.s32 %s1686_s14, %s2324_s24  ;;  %p76_p5 = scmp.gt.s32.totalorder %s1010_s22, 0 }
  0x80   : > { %s46_s25 = sor.u32 %s45_s12, %s44_s20  ;;  %p2278_p9 = scmp.eq.s32.totalorder %s1801_s16, 7 }
  0x81   : > { %p47_p7 = scmp.eq.s32.totalorder %s46_s25, 0  ;;  %s2328_s22 = smov (!%p76_p5, %s1010_s22), 0 }
  0x82   : > { %p1956_p11 = por %p2278_p9, %p56_p10  ;;  %s79_s23 = ssub.s32 %s2326_s17, %s2328_s22 }
  0x83   : > { %s1961_s7 = scalar_select %p47_p7, %s1670_s10, %s49_s11  }
  0x84   : > { %p2252_p13 = scmp.lt.s32.totalorder %s1690_s15, 8  ;;  %s1964_s26 = sor.u32 %s79_s23, %s44_s20 }
  0x85   : > { %s322_s3 = sand.u32 1, %s1670_s10   ;;  %s1017_s25 = sshll.u32 %s1682_s13, 1 }
  0x86   : > { %s1016_s12 = sshll.u32 %s322_s3, 4  ;;  %s1018_s8 = sshll.u32 %s1686_s14, 3 }
  0x87   : > { %s332_s30 = sadd.s32 %s1018_s8, %s1017_s25  ;;  %s326_s2 = scalar_lea.vmem [#allocation2], %s1016_s12 }
  0x88   : > { %s335_s4 = sshll.u32 %s326_s2, 4  ;;  %s1019_s6 = sshll.u32 %s332_s30, 7  ;;  %s1970_s4 = int_to_ptr.vmem [resolvable:$true] %s335_s4 }
  0x89   : > { %s1975_s11 = scalar_lea.hbm %s2227_s0, %s1019_s6  ;;  %p1981_p1 = pnand %p2252_p13, %p1942_p12 }
  0x8a   : > { %s1022_s2 = sshll.u32 %s2326_s17, 1  ;;  %s1987_s22 = scalar_lea.sflag [#allocation3], %s322_s3 }
  0x8b   : > { %s1985_s30 = sadd.s32 %s1022_s2, %s1018_s8  ;;  %s1496_s5 = scalar_lea.hbm %s1975_s11, 256 }
  0x8c   : > { %p1497_p3 = scmp.ne.s32.totalorder %s1975_s11, %s1496_s5  ;;  %p1498_p4 = pneg %p1981_p1 }
  0x8d   : > { %s1501_s19 = scalar_lea.hbm %s2227_s0, 2048  ;;  %p1502_p12 = scmp.lt.u32.totalorder %s1975_s11, %s2227_s0 }
  0x8e   : > { %p1499_p10 = pnand %p1498_p4, %p1497_p3  ;;  %p1503_p8 = scmp.lt.u32.totalorder %s1501_s19, %s1496_s5 }
  0x8f   : > { %p1505_p7 = scmp.lt.u32.totalorder %s1496_s5, %s1975_s11 }
  0x90   : > { %p1500_p6 = pneg %p1499_p10  ;;  %p1504_p5 = por %p1503_p8, %p1502_p12 }
  0x92   : > { %p1506_p9 = por %p1505_p7, %p1504_p5 }
  0x94   : > { %p1507_p13 = pnand %p1506_p9, %p1500_p6 }
  0x96   : > { %1510 = shalt.err (!%p1507_p13)
}
  0x97   : > { %s1511_s8 = scalar_lea.vmem %s1970_s4, 256  ;;  %s1697_s17 = smov [#allocation2]  }
  0x98   : > { %p1512_p3 = scmp.ne.s32.totalorder %s1970_s4, %s1511_s8  ;;  %s1516_s3 = sshll.u32 %s1697_s17, 4  ;;  %s1517_s3 = int_to_ptr.vmem [resolvable:$false] %s1516_s3 }
  0x99   : > { %s1518_s25 = scalar_lea.vmem %s1517_s3, 512  ;;  %p1519_p2 = scmp.lt.s32.totalorder %s1970_s4, %s1517_s3 }
  0x9a   : > { %p1514_p10 = pnand %p1512_p3, %p1498_p4  ;;  %p1520_p12 = scmp.lt.s32.totalorder %s1518_s25, %s1511_s8 }
  0x9c   : > { %p1515_p0 = pneg %p1514_p10  ;;  %p1521_p8 = por %p1520_p12, %p1519_p2 }
  0x9e   : > { %p1522_p5 = pnand %p1521_p8, %p1515_p0 }
  0xa0   : > { %1525 = shalt.err (!%p1522_p5)
}
  0xa1   : > { %s2281_s2 = smov 8   ;;  %s2282_s5 = smov 128  }
  0xa2   : > { %1301 = dma.hbm_to_vmem [thread:$0]  (!%p1981_p1), %s1975_s11, 256, %s1970_s4, %s1987_s22, %s2282_s5, %s2282_s5, %s2281_s2  }
  0xa3   : > { %s1024_s6 = sshll.u32 %s1985_s30, 7  ;;  %s83_s24 = sadd.s32 1, %s1658_s29 }
  0xa4   : > { %p2283_p0 = scmp.eq.s32.totalorder %s1964_s26, 0  ;;  %p90_p13 = scmp.ne.s32.totalorder %s1658_s29, %s1654_s28 }
  0xa5   : > { %s345_s19 = sand.u32 1, %s1690_s15   ;;  %s2031_s8 = scalar_lea.hbm %s2228_s1, %s1024_s6 }
  0xa6   : > { %s2023_s20 = scalar_select %p2283_p0, %s1658_s29, %s83_s24  }
  0xa7   : > { %s347_s17 = sand.u32 1, %s1658_s29   ;;  %p2284_p2 = scmp.eq.s32.totalorder %s1690_s15, 0 }
  0xa8   : > { %s1020_s4 = sshll.u32 %s347_s17, 4  ;;  %p2285_p1 = scmp.lt.s32.totalorder %s1690_s15, 8 }
  0xa9   : > { %p92_p4 = por %p90_p13, %p2284_p2  ;;  %s349_s11 = scalar_lea.vmem [#allocation5], %s1020_s4 }
  0xaa   : > { %s361_s30 = sshll.u32 %s349_s11, 4  ;;  %s2044_s22 = scalar_lea.sflag [#allocation6], %s345_s19  ;;  %s2042_s30 = int_to_ptr.vmem [resolvable:$true] %s361_s30 }
  0xab   : > { %p2038_p6 = pnand %p2285_p1, %p92_p4  ;;  %s1526_s3 = scalar_lea.hbm %s2031_s8, 256 }
  0xac   : > { %p1527_p7 = scmp.ne.s32.totalorder %s2031_s8, %s1526_s3  ;;  %s1531_s24 = scalar_lea.hbm %s2228_s1, 2048 }
  0xad   : > { %p1528_p9 = pneg %p2038_p6  ;;  %p1532_p12 = scmp.lt.u32.totalorder %s2031_s8, %s2228_s1 }
  0xae   : > { %p1533_p8 = scmp.lt.u32.totalorder %s1531_s24, %s1526_s3  ;;  %p1535_p0 = scmp.lt.u32.totalorder %s1526_s3, %s2031_s8 }
  0xaf   : > { %p1529_p3 = pnand %p1528_p9, %p1527_p7 }
  0xb0   : > { %p1534_p5 = por %p1533_p8, %p1532_p12 }
  0xb1   : > { %p1530_p10 = pneg %p1529_p3 }
  0xb2   : > { %p1536_p13 = por %p1535_p0, %p1534_p5 }
  0xb4   : > { %p1537_p2 = pnand %p1536_p13, %p1530_p10 }
  0xb6   : > { %1540 = shalt.err (!%p1537_p2)
}
  0xb7   : > { %s1541_s19 = scalar_lea.vmem %s2042_s30, 256  ;;  %s1698_s17 = smov [#allocation5]  }
  0xb8   : > { %p1542_p4 = scmp.ne.s32.totalorder %s2042_s30, %s1541_s19  ;;  %s1546_s4 = sshll.u32 %s1698_s17, 4  ;;  %s1547_s4 = int_to_ptr.vmem [resolvable:$false] %s1546_s4 }
  0xb9   : > { %s1548_s11 = scalar_lea.vmem %s1547_s4, 512  ;;  %p1549_p3 = scmp.lt.s32.totalorder %s2042_s30, %s1547_s4 }
  0xba   : > { %p1544_p1 = pnand %p1542_p4, %p1528_p9  ;;  %p1550_p12 = scmp.lt.s32.totalorder %s1548_s11, %s1541_s19 }
  0xbc   : > { %p1545_p7 = pneg %p1544_p1  ;;  %p1551_p8 = por %p1550_p12, %p1549_p3 }
  0xbe   : > { %p1552_p5 = pnand %p1551_p8, %p1545_p7 }
  0xc0   : > { %1555 = shalt.err (!%p1552_p5)
}
  0xc1   : > { %1304 = dma.hbm_to_vmem [thread:$0]  (!%p2038_p6), %s2031_s8, 256, %s2042_s30, %s2044_s22, %s2282_s5, %s2282_s5, %s2281_s2  }
  0xc2   : > { %p2287_p9 = scmp.ne.s32.totalorder %s2269_s21, 0 }
  0xc3   : > { %s2078_s3 = sand.u32 (!%p2287_p9), 1, %s1666_s9   ;;  %p2288_p10 = scmp.ne.s32.totalorder (!%p2287_p9), %s2264_s18, 0 }
  0xc4   : > { %373 = sbr.rel (%p2287_p9) target bundleno = 723 (0x2d3), region = 52  ;;  %s1026_s25 = sshll.u32 (!%p2287_p9), %s2078_s3, 4 }
  0xc5   : > { %s376_s6 = scalar_lea.sflag (!%p2287_p9), [#allocation3], %s2078_s3  ;;  %s2084_s26 = scalar_lea.vmem (!%p2287_p9), [#allocation2], %s1026_s25 }
  0xcb   : > { %1629 = dma.done.wait (%p2288_p10), %s376_s6, 256  }
  0xcc   : > { %1631 = vsyncadd (%p2288_p10), %s376_s6, 4294967040  ;;  %s2289_s21 = sld [smem:[#allocation20_spill]]  ;;  %s384_s2 = sand.u32 1, %s1801_s16  }
  0xcd   : > { %s386_s5 = sand.u32 1, %s1654_s28   ;;  %s385_s30 = scalar_lea.sflag [#allocation6], %s384_s2 }
  0xce   : > { %s2092_s8 = sshll.u32 %s386_s5, 4 }
  0xcf   : > { %s388_s22 = scalar_lea.vmem [#allocation5], %s2092_s8 }
  0xd2   : > { %p2290_p6 = scmp.ne.s32.totalorder %s2289_s21, 0 }
  0xd4   : > { %1633 = dma.done.wait (%p2290_p6), %s385_s30, 256  }
  0xd5   : > { %1635 = vsyncadd (%p2290_p6), %s385_s30, 4294967040  ;;  %p2291_p0 = scmp.eq.s32.totalorder %s1801_s16, 0 }
  0xd7   : > { %1637 = dma.done.wait (%p2291_p0), [#allocation6], 4096   ;;  %p2292_p13 = pmov %p2291_p0 }
  0xd8   : > { %p2293_p2 = pmov %p2291_p0 }
  0xd9   : > { %1639 = vsyncadd (%p2292_p13), [#allocation6], 4294963200 }
  0xda   : > { %1641 = dma.done.wait (%p2293_p2), [#allocation9], 6144   ;;  %p2294_p4 = pmov %p2291_p0 }
  0xdb   : > { %s2295_s18 = sld [smem:[#allocation18_spill]]  ;;  %v488_v0 = vld [vmem:[#allocation7 + $0x80] sm:$0xff]  ;;  %v489_v1 = vld [vmem:[#allocation7 + $0x88] sm:$0xff]  ;;  %v490_v5 = vld [vmem:[#allocation7 + $0x90] sm:$0xff]  ;;  %vm454_vm1 = vcmask 1041408   ;;  %vm463_vm2 = vcmask 1046528  }
  0xdc   : > { %1643 = vsyncadd (%p2294_p4), [#allocation9], 4294961152  ;;  %v472_v2 = vld [vmem:[#allocation7] sm:$0xff]  ;;  %v1174_v3 = vpack.c.bf16 %v489_v1, %v488_v0  ;;  %v473_v4 = vld [vmem:[#allocation7 + $0x8] sm:$0xff]  ;;  %s2298_s19 = sld [smem:[#allocation25_spill]]  ;;  %s2299_s17 = sld [smem:[#allocation19_spill]] }
  0xdd   : > { %v491_v6 = vld [vmem:[#allocation7 + $0x98] sm:$0xff]  ;;  %v1176_v7 = vpack.c.bf16 %v473_v4, %v472_v2  ;;  %v474_v9 = vld [vmem:[#allocation7 + $0x10] sm:$0xff]  ;;  %v492_v11 = vld [vmem:[#allocation7 + $0xa0] sm:$0xff]  ;;  %s2300_s6 = sld [smem:[#allocation27_spill]]  ;;  %s2301_s2 = sld [smem:[#allocation29_spill]] }
  0xde   : > { %v1178_v8 = vpack.c.bf16 %v491_v6, %v490_v5  ;;  %v475_v10 = vld [vmem:[#allocation7 + $0x18] sm:$0xff]  ;;  %1175 = vmatprep.subr.bf16.mxu0 %v1174_v3  ;;  %v493_v12 = vld [vmem:[#allocation7 + $0xa8] sm:$0xff]  ;;  %v476_v15 = vld [vmem:[#allocation7 + $0x20] sm:$0xff]  ;;  %s2302_s12 = sld [smem:[#allocation30_spill]]  ;;  %s848_s4 = scalar_lea.sflag [#allocation4], %s2078_s3 }
  0xdf   : > { %1177 = vmatpush3.bf16.msra.mxu0 %v1176_v7  ;;  %v1180_v13 = vpack.c.bf16 %v475_v10, %v474_v9  ;;  %v1182_v14 = vpack.c.bf16 %v493_v12, %v492_v11  ;;  %v477_v16 = vld [vmem:[#allocation7 + $0x28] sm:$0xff]  ;;  %v494_v17 = vld [vmem:[#allocation7 + $0xb0] sm:$0xff]  ;;  %v495_v18 = vld [vmem:[#allocation7 + $0xb8] sm:$0xff]  ;;  %s1699_s11 = smov [#allocation11]  }
  0xe0   : > { %1179 = vmatprep.subr.bf16.mxu0 %v1178_v8  ;;  %v1184_v20 = vpack.c.bf16 %v477_v16, %v476_v15  ;;  %v1186_v21 = vpack.c.bf16 %v495_v18, %v494_v17  ;;  %v478_v22 = vld [vmem:[#allocation7 + $0x30] sm:$0xff]  ;;  %v479_v23 = vld [vmem:[#allocation7 + $0x38] sm:$0xff]  ;;  %v496_v25 = vld [vmem:[#allocation7 + $0xc0] sm:$0xff] }
  0xe1   : > { %p444_p1 = scmp.eq.s32.totalorder %s2295_s18, 0  ;;  %v497_v26 = vld [vmem:[#allocation7 + $0xc8] sm:$0xff]  ;;  %v2113_v27 = vld [vmem:[%s2084_s26] sm:$0xff]  ;;  %v1188_v34 = vpack.c.bf16 %v479_v23, %v478_v22  ;;  %v646_v46 = vld [vmem:[#allocation8 + $0x98] sm:$0xff]  ;;  %p598_p7 = scmp.ne.s32.totalorder %s2295_s18, 0 }
  0xe2   : > { %v480_v28 = vld [vmem:[#allocation7 + $0x40] sm:$0xff]  ;;  %v481_v29 = vld [vmem:[#allocation7 + $0x48] sm:$0xff]  ;;  %v455_v32 = vrot.slane %v2113_v27, 6  ;;  %v1190_v40 = vpack.c.bf16 %v497_v26, %v496_v25  ;;  %v498_v41 = vld [vmem:[#allocation7 + $0xd0] sm:$0xff]  ;;  %s1037_s5 = sshll.u32 %s2295_s18, 1  ;;  %s1038_s8 = sshll.u32 %s2299_s17, 3 }
  0xe3   : > { %s448_s24 = scalar_select %p444_p1, 1, 0  ;;  %1181 = vmatpush3.bf16.msra.mxu0 %v1180_v13  ;;  %v2116_v30 = vld [vmem:[%s2084_s26 + $0x8] sm:$0xff]  ;;  %v643_v33 = vld [vmem:[#allocation8 + $0x80] sm:$0xff]  ;;  %v645_v45 = vld [vmem:[#allocation8 + $0x90] sm:$0xff]  ;;  %v1192_v56 = vpack.c.bf16 %v481_v29, %v480_v28 }
  0xe4   : > { %1183 = vmatprep.subr.bf16.mxu0 %v1182_v14  ;;  %v447_v31 = vld [vmem:[%s388_s22 + $0xe] sm:$0x3]  ;;  %v2124_v36 = vrot.slane %v2116_v30, 6  ;;  %v627_v38 = vld [vmem:[#allocation8] sm:$0xff]  ;;  %v1210_v50 = vpack.c.bf16 %v646_v46, %v645_v45  ;;  %v629_v51 = vld [vmem:[#allocation8 + $0x10] sm:$0xff]  ;;  %s860_s30 = sadd.s32 %s1038_s8, %s1037_s5  ;;  %s437_s22 = scalar_lea.vmem [#allocation11], %s1026_s25 }
  0xe5   : > { %v449_v19 = vstv %s448_s24  ;;  %v644_v37 = vld [vmem:[#allocation8 + $0x88] sm:$0xff]  ;;  %v499_v47 = vld [vmem:[#allocation7 + $0xd8] sm:$0xff]  ;;  %v647_v54 = vld [vmem:[#allocation8 + $0xa0] sm:$0xff]  ;;  %s602_s16 = scalar_select %p598_p7, 1, 0 }
  0xe6   : > { %vm2108_vm0 = vcmp.eq.s32.totalorder %v449_v19, 1  ;;  %v628_v39 = vld [vmem:[#allocation8 + $0x8] sm:$0xff]  ;;  %v1206_v43 = vpack.c.bf16 %v644_v37, %v643_v33  ;;  %v2131_v48 = vsel %vm454_vm1, %v455_v32, %v2124_v36  ;;  %v630_v52 = vld [vmem:[#allocation8 + $0x18] sm:$0xff]  ;;  %v482_v57 = vld [vmem:[#allocation7 + $0x50] sm:$0xff]  ;;  %v1194_v60 = vpack.c.bf16 %v499_v47, %v498_v41  ;;  %s863_s24 = sshll.u32 %s437_s22, 4  ;;  %s2159_s24 = int_to_ptr.vmem [resolvable:$true] %s863_s24 }
  0xe7   : > { %1185 = vmatpush3.bf16.msra.mxu0 %v1184_v20  ;;  %v451_v35 = vsel %vm2108_vm0, 0.0, %v447_v31  ;;  %v1208_v44 = vpack.c.bf16 %v628_v39, %v627_v38  ;;  %v465_v53 = vrot.slane %v2131_v48, 1  ;;  %v648_v55 = vld [vmem:[#allocation8 + $0xa8] sm:$0xff]  ;;  %v483_v58 = vld [vmem:[#allocation7 + $0x58] sm:$0xff]  ;;  %v1212_v59 = vpack.c.bf16 %v630_v52, %v629_v51  ;;  %v500_v61 = vld [vmem:[#allocation7 + $0xe0] sm:$0xff]  ;;  %s1556_s25 = scalar_lea.vmem %s2159_s24, 256 }
  0xe8   : > { %1187 = vmatprep.subr.bf16.mxu0 %v1186_v21  ;;  %v2127_v42 = vsel %vm454_vm1, %v451_v35, %v455_v32  ;;  %1207 = vmatprep.subr.bf16.mxu1 %v1206_v43  ;;  %v1214_v63 = vpack.c.bf16 %v648_v55, %v647_v54  ;;  %v631_v0 = vld [vmem:[#allocation8 + $0x20] sm:$0xff]  ;;  %v632_v1 = vld [vmem:[#allocation8 + $0x28] sm:$0xff]  ;;  %v649_v3 = vld [vmem:[#allocation8 + $0xb0] sm:$0xff]  ;;  %v1196_v5 = vpack.c.bf16 %v483_v58, %v482_v57  ;;  %v467_v23 = vrot.slane %v2124_v36, 1  ;;  %p1557_p3 = scmp.ne.s32.totalorder %s2159_s24, %s1556_s25 }
  0xe9   : > { %v464_v49 = vrot.slane %v2127_v42, 1  ;;  %1209 = vmatpush3.bf16.msra.mxu1 %v1208_v44  ;;  %v501_v2 = vld [vmem:[#allocation7 + $0xe8] sm:$0xff]  ;;  %v650_v4 = vld [vmem:[#allocation8 + $0xb8] sm:$0xff]  ;;  %v484_v6 = vld [vmem:[#allocation7 + $0x60] sm:$0xff]  ;;  %v1216_v7 = vpack.c.bf16 %v632_v1, %v631_v0 }
  0xea   : > { %1211 = vmatprep.subr.bf16.mxu1 %v1210_v50  ;;  %v1198_v8 = vpack.c.bf16 %v501_v2, %v500_v61  ;;  %v485_v9 = vld [vmem:[#allocation7 + $0x68] sm:$0xff]  ;;  %v1218_v10 = vpack.c.bf16 %v650_v4, %v649_v3  ;;  %v633_v11 = vld [vmem:[#allocation8 + $0x30] sm:$0xff]  ;;  %v634_v12 = vld [vmem:[#allocation8 + $0x38] sm:$0xff]  ;;  %v468_v28 = vsel %vm463_vm2, %v465_v53, %v467_v23  ;;  %p1558_p12 = pnand %p1557_p3, %p1956_p11 }
  0xeb   : > { %1189 = vmatpush3.bf16.msra.mxu0 %v1188_v34  ;;  %v466_v62 = vsel %vm463_vm2, %v464_v49, %v465_v53  ;;  %v502_v13 = vld [vmem:[#allocation7 + $0xf0] sm:$0xff]  ;;  %v503_v14 = vld [vmem:[#allocation7 + $0xf8] sm:$0xff]  ;;  %v1200_v15 = vpack.c.bf16 %v485_v9, %v484_v6  ;;  %v1220_v16 = vpack.c.bf16 %v634_v12, %v633_v11  ;;  %v743_v20 = vld [vmem:[#allocation10] sm:$0xff]  ;;  %v603_v11 = vstv %s602_s16  ;;  %s1039_s16 = sshll.u32 %s860_s30, 7 }
  0xec   : > { %1191 = vmatprep.subr.bf16.mxu0 %v1190_v40  ;;  %575 = vmatprep.mubr.f32.mxu0 %v466_v62  ;;  %v1202_v17 = vpack.c.bf16 %v503_v14, %v502_v13  ;;  %v486_v18 = vld [vmem:[#allocation7 + $0x70] sm:$0xff]  ;;  %v487_v19 = vld [vmem:[#allocation7 + $0x78] sm:$0xff]  ;;  %v744_v21 = vld [vmem:[#allocation10 + $0x8] sm:$0xff]  ;;  %vm604_vm4 = vcmp.eq.s32.totalorder %v603_v11, 1  ;;  %s2164_s17 = scalar_lea.hbm %s2302_s12, %s1039_s16  ;;  %p1559_p8 = pneg %p1558_p12 }
  0xed   : > { %1213 = vmatpush3.bf16.msra.mxu1 %v1212_v59  ;;  %v1204_v22 = vpack.c.bf16 %v487_v19, %v486_v18  ;;  %v1238_v24 = vpack.c.bf16 %v744_v21, %v743_v20  ;;  %v745_v25 = vld [vmem:[#allocation10 + $0x10] sm:$0xff]  ;;  %v746_v26 = vld [vmem:[#allocation10 + $0x18] sm:$0xff]  ;;  %v747_v31 = vld [vmem:[#allocation10 + $0x20] sm:$0xff] }
  0xee   : > { %1215 = vmatprep.subr.bf16.mxu1 %v1214_v63  ;;  %v1242_v29 = vpack.c.bf16 %v746_v26, %v745_v25  ;;  %v748_v32 = vld [vmem:[#allocation10 + $0x28] sm:$0xff]  ;;  %v651_v34 = vld [vmem:[#allocation8 + $0xc0] sm:$0xff]  ;;  %v749_v37 = vld [vmem:[#allocation10 + $0x30] sm:$0xff] }
  0xef   : > { %1193 = vmatpush3.bf16.msra.mxu0 %v1192_v56  ;;  %v1246_v33 = vpack.c.bf16 %v748_v32, %v747_v31  ;;  %v652_v35 = vld [vmem:[#allocation8 + $0xc8] sm:$0xff]  ;;  %v750_v39 = vld [vmem:[#allocation10 + $0x38] sm:$0xff]  ;;  %v635_v40 = vld [vmem:[#allocation8 + $0x40] sm:$0xff] }
  0xf0   : > { %1195 = vmatprep.subr.bf16.mxu0 %v1194_v60  ;;  %v1222_v38 = vpack.c.bf16 %v652_v35, %v651_v34  ;;  %v636_v41 = vld [vmem:[#allocation8 + $0x48] sm:$0xff]  ;;  %v653_v44 = vld [vmem:[#allocation8 + $0xd0] sm:$0xff]  ;;  %v654_v45 = vld [vmem:[#allocation8 + $0xd8] sm:$0xff] }
  0xf1   : > { %1217 = vmatpush3.bf16.msra.mxu1 %v1216_v7  ;;  %v1224_v43 = vpack.c.bf16 %v636_v41, %v635_v40  ;;  %v751_v46 = vld [vmem:[#allocation10 + $0x40] sm:$0xff]  ;;  %v752_v47 = vld [vmem:[#allocation10 + $0x48] sm:$0xff]  ;;  %v753_v53 = vld [vmem:[#allocation10 + $0x50] sm:$0xff] }
  0xf2   : > { %1219 = vmatprep.subr.bf16.mxu1 %v1218_v10  ;;  %v1254_v49 = vpack.c.bf16 %v752_v47, %v751_v46  ;;  %v655_v51 = vld [vmem:[#allocation8 + $0xe0] sm:$0xff]  ;;  %v656_v52 = vld [vmem:[#allocation8 + $0xe8] sm:$0xff]  ;;  %v754_v55 = vld [vmem:[#allocation10 + $0x58] sm:$0xff] }
  0xf3   : > { %1197 = vmatpush3.bf16.msra.mxu0 %v1196_v5  ;;  %v1230_v54 = vpack.c.bf16 %v656_v52, %v655_v51  ;;  %v639_v56 = vld [vmem:[#allocation8 + $0x60] sm:$0xff]  ;;  %v640_v57 = vld [vmem:[#allocation8 + $0x68] sm:$0xff]  ;;  %v1258_v58 = vpack.c.bf16 %v754_v55, %v753_v53  ;;  %v657_v60 = vld [vmem:[#allocation8 + $0xf0] sm:$0xff] }
  0xf4   : > { %1199 = vmatprep.subr.bf16.mxu0 %v1198_v8  ;;  %v1232_v59 = vpack.c.bf16 %v640_v57, %v639_v56  ;;  %v658_v61 = vld [vmem:[#allocation8 + $0xf8] sm:$0xff]  ;;  %v755_v62 = vld [vmem:[#allocation10 + $0x60] sm:$0xff]  ;;  %v756_v0 = vld [vmem:[#allocation10 + $0x68] sm:$0xff]  ;;  %v594_v8 = vlaneseq }
  0xf5   : > { %1221 = vmatpush3.bf16.msra.mxu1 %v1220_v16  ;;  %v1234_v63 = vpack.c.bf16 %v658_v61, %v657_v60  ;;  %v641_v1 = vld [vmem:[#allocation8 + $0x70] sm:$0xff]  ;;  %v642_v2 = vld [vmem:[#allocation8 + $0x78] sm:$0xff]  ;;  %v1262_v3 = vpack.c.bf16 %v756_v0, %v755_v62  ;;  %v1032_v12 = vld [vmem:[%s2298_s19] ss:$0 sm:$0xff]  ;;  %s2303_s19 = smov %s2302_s12 }
  0xf6   : > { %1223 = vmatprep.subr.bf16.mxu1 %v1222_v38  ;;  %v1236_v4 = vpack.c.bf16 %v642_v2, %v641_v1  ;;  %v757_v5 = vld [vmem:[#allocation10 + $0x70] sm:$0xff]  ;;  %v758_v6 = vld [vmem:[#allocation10 + $0x78] sm:$0xff]  ;;  %v595_v9 = vshrl.u32 %v594_v8, 7  ;;  %v1033_v38 = vld [vmem:[%s2300_s6] ss:$0 sm:$0xff]  ;;  %s1560_s6 = sshll.u32 %s1699_s11, 4  ;;  %s1561_s6 = int_to_ptr.vmem [resolvable:$false] %s1560_s6 }
  0xf7   : > { %1201 = vmatpush3.bf16.msra.mxu0 %v1200_v15  ;;  %v1266_v7 = vpack.c.bf16 %v758_v6, %v757_v5  ;;  %v1035_v40 = vld [vmem:[%s2301_s2] ss:$0 sm:$0xff]  ;;  %s1562_s26 = scalar_lea.vmem %s1561_s6, 512  ;;  %p1563_p5 = scmp.lt.s32.totalorder %s2159_s24, %s1561_s6 }
  0xf8   : > { %1203 = vmatprep.subr.bf16.mxu0 %v1202_v17  ;;  %vm599_vm3 = vcmp.ge.s32.totalorder %v595_v9, 1  ;;  %p1564_p9 = scmp.lt.s32.totalorder %s1562_s26, %s1556_s25 }
  0xf9   : > { %1225 = vmatpush3.bf16.msra.mxu1 %v1224_v43  ;;  %vm605_vm5 = vmor %vm604_vm4, %vm599_vm3 }
  0xfa   : > { %p1565_p10 = por %p1564_p9, %p1563_p5 }
  0xfb   : > { %1205 = vmatpush3.bf16.msra.mxu0 %v1204_v22 }
  0xfc   : > { %1239 = vmatprep.subr.bf16.mxu0 %v1238_v24  ;;  %p1566_p6 = pnand %p1565_p10, %p1559_p8 }
  0xfe   : > { %576 = vmatmul.mubr.f32.vlgmr.msra.gmra.mrb[0].mxu0 %v2127_v42  ;;  %v1250_v42 = vpack.c.bf16 %v750_v39, %v749_v37 }
  0xff   : > { %580 = vmatprep.mubr.f32.mxu0 %v468_v28  ;;  %1241 = vmatpush3.bf16.msra.mxu0 %v1238_v24 }
 0x100   : > { %1243 = vmatprep.subr.bf16.mxu0 %v1242_v29 }
 0x102   : > { %581 = vmatmul.mubr.f32.gmra.mrb[2].mxu0 %v2131_v48  ;;  %v637_v48 = vld [vmem:[#allocation8 + $0x50] sm:$0xff] }
 0x103   : > { %585 = vmatprep.mubr.f32.mxu0 %v467_v23  ;;  %1245 = vmatpush3.bf16.msra.mxu0 %v1242_v29 }
 0x104   : > { %1247 = vmatprep.subr.bf16.mxu0 %v1246_v33 }
 0x106   : > { %586 = vmatmul.mubr.f32.gmra.mrb[4].mxu0 %v2124_v36  ;;  %v1226_v36 = vpack.c.bf16 %v654_v45, %v653_v44 }
 0x107   : > { %1249 = vmatpush3.bf16.msra.mxu0 %v1246_v33  ;;  %1171 = vmatprep.mubr.f32.mxu0 %v2113_v27  ;;  %v638_v27 = vld [vmem:[#allocation8 + $0x58] sm:$0xff] }
 0x108   : > { %1251 = vmatprep.subr.bf16.mxu0 %v1250_v42  ;;  %v1228_v50 = vpack.c.bf16 %v638_v27, %v637_v48  ;;  %1227 = vmatprep.subr.bf16.mxu1 %v1226_v36 }
 0x10a   : > { %1229 = vmatpush3.bf16.msra.mxu1 %v1228_v50 }
 0x10b   : > { %1253 = vmatpush3.bf16.msra.mxu0 %v1250_v42  ;;  %1231 = vmatprep.subr.bf16.mxu1 %v1230_v54 }
 0x10c   : > { %1255 = vmatprep.subr.bf16.mxu0 %v1254_v49 }
 0x10e   : > { %1233 = vmatpush3.bf16.msra.mxu1 %v1232_v59 }
 0x10f   : > { %1257 = vmatpush3.bf16.msra.mxu0 %v1254_v49  ;;  %1235 = vmatprep.subr.bf16.mxu1 %v1234_v63 }
 0x110   : > { %1259 = vmatprep.subr.bf16.mxu0 %v1258_v58 }
 0x112   : > { %1237 = vmatpush3.bf16.msra.mxu1 %v1236_v4 }
 0x113   : > { %1261 = vmatpush3.bf16.msra.mxu0 %v1258_v58 }
 0x114   : > { %1263 = vmatprep.subr.bf16.mxu0 %v1262_v3 }
 0x117   : > { %1265 = vmatpush3.bf16.msra.mxu0 %v1262_v3 }
 0x118   : > { %1267 = vmatprep.subr.bf16.mxu0 %v1266_v7 }
 0x11b   : > { %1269 = vmatpush3.bf16.msra.mxu0 %v1266_v7 }
 0x11e   : > { %1172 = vmatmul.mubr.f32.vlgmr.msra.gmra.mrb[6].mxu0 %v2116_v30 }
 0x1d1   : > { %v1074_v10 = vpop.f32.mrb[0].mxu0 }
 0x1d2   : > { %v1075_v13 = vpop.f32.mrb[1].mxu0 }
 0x1d3   : > { %v1076_v14 = vadd.f32 %v1075_v13, %v1074_v10 }
 0x1d5   : > { %v578_v15 = vadd.f32 %v1076_v14, %v1032_v12  ;;  %v1077_v16 = vpop.f32.mrb[2].mxu0 }
 0x1d6   : > { %v1078_v17 = vpop.f32.mrb[3].mxu0 }
 0x1d7   : > { %v591_v18 = vmax.f32 %v578_v15, 0.0  ;;  %v1079_v19 = vadd.f32 %v1078_v17, %v1077_v16 }
 0x1d9   : > { %v583_v30 = vadd.f32 %v1079_v19, %v1032_v12  ;;  %v1080_v20 = vpop.f32.mrb[4].mxu0  ;;  %v614_v22 = vsel %vm605_vm5, %v591_v18, 0.0 }
 0x1da   : > { %v1081_v21 = vpop.f32.mrb[5].mxu0  ;;  %v620_v26 = vrot.slane %v614_v22, 1 }
 0x1db   : > { %v592_v23 = vmax.f32 %v583_v30, 0.0  ;;  %v1082_v24 = vadd.f32 %v1081_v21, %v1080_v20 }
 0x1dd   : > { %v588_v25 = vadd.f32 %v1082_v24, %v1032_v12  ;;  %v621_v28 = vrot.slane %v592_v23, 1 }
 0x1df   : > { %v593_v29 = vmax.f32 %v588_v25, 0.0  ;;  %v622_v31 = vsel %vm463_vm2, %v620_v26, %v621_v28 }
 0x1e0   : > { %730 = vmatprep.mubr.f32.mxu1 %v622_v31 }
 0x1e1   : > { %v623_v32 = vrot.slane %v593_v29, 1  ;;  %1034 = vmatmul.mubr.msk.f32.vlgmr.msra.gmra.mrb[0].mxu1 %vm605_vm5, %v591_v18 }
 0x1e3   : > { %v624_v33 = vsel %vm463_vm2, %v621_v28, %v623_v32 }
 0x1e4   : > { %735 = vmatprep.mubr.f32.mxu1 %v624_v33 }
 0x1e5   : > { %736 = vmatmul.mubr.f32.gmra.mrb[2].mxu1 %v592_v23 }
 0x1f1   : > { %v1173_v34 = vpop.f32.mrb[6].mxu0 }
 0x1f2   : > { %v832_v35 = vpop.f32.mrb[7].mxu0  ;;  %v838_v47 = vadd.f32 %v1173_v34, %v1035_v40 }
 0x1f3   : > { %v833_v44 = vadd.f32 %v1035_v40, %v832_v35 }
 0x2b4   : > { %v1115_v37 = vpop.f32.mrb[0].mxu1 }
 0x2b5   : > { %v1116_v39 = vpop.f32.mrb[1].mxu1 }
 0x2b6   : > { %v1117_v41 = vadd.f32 %v1116_v39, %v1115_v37 }
 0x2b8   : > { %v733_v42 = vadd.f32 %v1117_v41, %v1033_v38  ;;  %v1118_v43 = vpop.f32.mrb[2].mxu1 }
 0x2b9   : > { %v1119_v45 = vpop.f32.mrb[3].mxu1 }
 0x2ba   : > { %v741_v46 = vmax.f32 %v733_v42, 0.0  ;;  %v1120_v36 = vadd.f32 %v1119_v45, %v1118_v43 }
 0x2bc   : > { %v738_v48 = vadd.f32 %v1120_v36, %v1033_v38  ;;  %v841_v27 = vadd.f32 %v833_v44, %v741_v46 }
 0x2be   : > { %v742_v49 = vmax.f32 %v738_v48, 0.0  ;;  %v843_v50 = vmax.f32 %v841_v27, 0.0 }
 0x2c0   : > { %v842_v51 = vadd.f32 %v838_v47, %v742_v49  ;;  %845 = vst [vmem:[%s437_s22] sm:$0xff] %v843_v50 }
 0x2c2   : > { %v844_v52 = vmax.f32 %v842_v51, 0.0 }
 0x2c4   : > { %846 = vst [vmem:[%s437_s22 + $0x8] sm:$0xff] %v844_v52 }
 0x2c5   : > { %1569 = shalt.err (!%p1566_p6)
}
 0x2c6   : > { %s1570_s21 = scalar_lea.hbm %s2164_s17, 256  ;;  %s1574_s8 = scalar_lea.hbm %s2303_s19, 2048 }
 0x2c7   : > { %p1571_p0 = scmp.ne.s32.totalorder %s2164_s17, %s1570_s21  ;;  %p1575_p4 = scmp.lt.u32.totalorder %s2164_s17, %s2303_s19 }
 0x2c8   : > { %p1576_p1 = scmp.lt.u32.totalorder %s1574_s8, %s1570_s21  ;;  %p1578_p3 = scmp.lt.u32.totalorder %s1570_s21, %s2164_s17 }
 0x2c9   : > { %p1572_p13 = pnand %p1571_p0, %p1956_p11 }
 0x2ca   : > { %p1577_p7 = por %p1576_p1, %p1575_p4 }
 0x2cb   : > { %p1573_p2 = pneg %p1572_p13 }
 0x2cc   : > { %p1579_p12 = por %p1578_p3, %p1577_p7 }
 0x2ce   : > { %p1580_p8 = pnand %p1579_p12, %p1573_p2 }
 0x2d0   : > { %1583 = shalt.err (!%p1580_p8)
}
 0x2d1   : > { %s1700_s16 = smov 128   ;;  %s1701_s18 = smov 8  }
 0x2d2   : > { %1286 = dma.vmem_to_hbm [thread:$0]  (%p1956_p11), %s2159_s24, 256, %s2164_s17, %s848_s4, %s1700_s16, %s1700_s16, %s1701_s18  }
 0x2d3 PF: > { %s2304_s23 = sld [smem:[#allocation17_spill]]  ;;  %s2305_s12 = sld [smem:[#allocation21_spill]] }
 0x2d4   : > { %p1316_p5 = scmp.ge.s32.totalorder %s1690_s15, 2 }
 0x2d9   : > { %s878_s25 = sand.u32 1, %s2304_s23   ;;  %p2306_p9 = scmp.ne.s32.totalorder %s2305_s12, 0 }
 0x2da   : > { %s879_s11 = scalar_lea.sflag [#allocation4], %s878_s25 }
 0x2db   : > { %p1306_p10 = pnand %p1316_p5, %p2306_p9 }
 0x2dd   : > { %1645 = dma.done.wait (!%p1306_p10), %s879_s11, 256  }
 0x2de   : > { %1647 = vsyncadd (!%p1306_p10), %s879_s11, 4294967040  ;;  %s28_s15 = sadd.s32 1, %s1690_s15   ;;  %s2307_s3 = sld [smem:[#allocation22_spill]] }
 0x2df   : > { %p25_p6 = scmp.ge.s32.totalorder %s28_s15, 10   ;;  %s2308_s24 = sld [smem:[#allocation23_spill]] }
 0x2e0   : > { %s2309_s27 = smov %s1654_s28  ;;  %s2310_s28 = smov %s1658_s29 }
 0x2e1   : > { %s2311_s29 = smov %s2023_s20  ;;  %s2312_s30 = smov %s1666_s9 }
 0x2e2   : > { %s2313_s9 = smov %s1670_s10  ;;  %s2314_s10 = smov %s1961_s7 }
 0x2e3   : > { %s2315_s11 = smov %s1682_s13  ;;  %s2316_s12 = smov %s1686_s14 }
 0x2e4   : > { %s2317_s13 = smov %s2307_s3  ;;  %27 = sbr.rel (!%p25_p6) target bundleno = 20 (0x14), region = 122 }
 0x2e5   : > { %s2318_s14 = smov %s2308_s24 }
 0x2eb   :  { %884 = vsyncpa [#allocation3], 1 }
 0x2ec   :  { %886 = vsyncpa [#allocation3 + $0x1], 1 }
 0x2ed   :  { %887 = vsyncpa [#allocation6], 1 }
 0x2ee   :  { %889 = vsyncpa [#allocation6 + $0x1], 1 }
 0x2ef   :  { %890 = vsyncpa [#allocation9], 1 }
 0x2f0   :  { %891 = vsyncpa [#allocation4], 1 }
 0x2f1   :  { %893 = vsyncpa [#allocation4 + $0x1], 1 }

</bundles_post_ra>
